<compile_context>
chip_gen: v5e
topology: v5e:2x2
jax: 0.10.0
libtpu: 0.0.40
codegen_flags: <defaults>
</compile_context>

<pallas_src>
import jax
import jax.numpy as jnp
from jax.experimental import pallas as pl
from jax.experimental.pallas import tpu as pltpu

EMBED_LEN = 16          # LSTM input size  (embed_length)
HIDDEN_LEN = 32         # LSTM hidden size (hidden_length)
K_FUSED = EMBED_LEN + HIDDEN_LEN   # 48 — contraction depth of the fused gate matmul
LANES = 128             # 4 * HIDDEN_LEN == one full vreg row
ROW_TILE = 8            # batch rows per grid step (one sublane group)

# Parameter-slab row layout (all section starts are multiples of 8)
ROW_WF = 0              # fused [Wih; Whh], i/f/o columns pre-scaled by 0.5   (48, 128)
ROW_BF = 48             # fused bias (b_ih + b_hh), i/f/o pre-scaled by 0.5   (1, 128)
ROW_WH = 56             # folded head weight row, lanes 0..H-1                (1, 128)
ROW_BH = 64             # folded head bias, lane-replicated                   (1, 128)
SLAB_ROWS = 72


def _lstm_head_kernel(xh_ref, c0_ref, slab_ref, out_ref):
    H = HIDDEN_LEN

    # Fused LSTM gate matmul: [x | h0] (TB, 48) @ [Wih; Whh] (48, 128) + bias.
    xh = xh_ref[:, 0:K_FUSED]                                           # (TB, 48)
    gates = (jnp.dot(xh, slab_ref[ROW_WF:ROW_WF + K_FUSED, :],
                     preferred_element_type=jnp.float32)
             + slab_ref[ROW_BF:ROW_BF + 1, :])                          # (TB, 128)

    # Single tanh pass over all 128 gate lanes; sigmoid(x) = 0.5*tanh(x/2)+0.5
    # (i/f/o columns were pre-scaled by 0.5 at pack time, g column left alone).
    t = jnp.tanh(gates)
    s = 0.5 * t + 0.5

    i_g = s[:, 0 * H:1 * H]
    f_g = s[:, 1 * H:2 * H]
    g_g = t[:, 2 * H:3 * H]
    o_g = s[:, 3 * H:4 * H]

    c0 = c0_ref[:, 0:H]                                                 # (TB, H)
    c1 = f_g * c0 + i_g * g_g
    h1 = o_g * jnp.tanh(c1)                                             # (TB, H)

    # Folded activation-free MLP head as VPU multiply + XLU lane reduction
    # (no second MXU push/drain on the critical path).
    w_head = slab_ref[ROW_WH:ROW_WH + 1, 0:H]                           # (1, H)
    y = jnp.sum(h1 * w_head, axis=-1, keepdims=True)                    # (TB, 1)
    out_ref[...] = y + slab_ref[ROW_BH:ROW_BH + 1, :]                   # (TB, 128)


def init_params(key):
    """Deterministic per-layer parameters (PyTorch-style uniform(-k, k)).

    Stored pre-transposed as (in_features, out_features) so y = x @ W + b.
    """
    E, H = EMBED_LEN, HIDDEN_LEN
    ks = jax.random.split(key, 12)

    def unif(k, shape, bound):
        return jax.random.uniform(k, shape, jnp.float32, -bound, bound)

    k_lstm = 1.0 / jnp.sqrt(H)
    return {
        "wih_t": unif(ks[0], (E, 4 * H), k_lstm),
        "whh_t": unif(ks[1], (H, 4 * H), k_lstm),
        "b_ih":  unif(ks[2], (1, 4 * H), k_lstm),
        "b_hh":  unif(ks[3], (1, 4 * H), k_lstm),
        "w1_t":  unif(ks[4], (H, 64), 1.0 / jnp.sqrt(H)),
        "b1":    unif(ks[5], (1, 64), 1.0 / jnp.sqrt(H)),
        "w2_t":  unif(ks[6], (64, 32), 1.0 / jnp.sqrt(64)),
        "b2":    unif(ks[7], (1, 32), 1.0 / jnp.sqrt(64)),
        "w3_t":  unif(ks[8], (32, 16), 1.0 / jnp.sqrt(32)),
        "b3":    unif(ks[9], (1, 16), 1.0 / jnp.sqrt(32)),
        "w4_t":  unif(ks[10], (16, 1), 1.0 / jnp.sqrt(16)),
        "b4":    unif(ks[11], (1, 1), 1.0 / jnp.sqrt(16)),
    }


def pack_params(raw):
    """Fold + pack all parameters into a single (SLAB_ROWS, 128) f32 slab."""
    E, H = EMBED_LEN, HIDDEN_LEN

    # Fused LSTM weight/bias (gate column order i|f|g|o preserved).
    w_fused = jnp.concatenate([raw["wih_t"], raw["whh_t"]], axis=0)    # (48, 4H)
    b_fused = (raw["b_ih"] + raw["b_hh"]).reshape(1, 4 * H)            # (1, 4H)

    # sigmoid-as-tanh fold: scale i/f/o pre-activations by 0.5 (exact algebra).
    gate_scale = jnp.concatenate(
        [jnp.full((1, H), 0.5), jnp.full((1, H), 0.5),
         jnp.ones((1, H)), jnp.full((1, H), 0.5)], axis=1)             # (1, 4H)
    w_fused = w_fused * gate_scale
    b_fused = b_fused * gate_scale

    # Exact algebraic fold of the activation-free 4-layer head.
    w_head = raw["w1_t"] @ raw["w2_t"] @ raw["w3_t"] @ raw["w4_t"]     # (H, 1)
    b_head = (((raw["b1"] @ raw["w2_t"] + raw["b2"]) @ raw["w3_t"]
               + raw["b3"]) @ raw["w4_t"] + raw["b4"])                 # (1, 1)

    slab = jnp.zeros((SLAB_ROWS, LANES), jnp.float32)
    slab = slab.at[ROW_WF:ROW_WF + E + H, :].set(w_fused)
    slab = slab.at[ROW_BF, :].set(b_fused[0])
    slab = slab.at[ROW_WH, :H].set(w_head[:, 0])
    slab = slab.at[ROW_BH, :].set(jnp.full((LANES,), b_head[0, 0], jnp.float32))
    return slab


@jax.jit
def _lstm_forward_jit(slab, seqs, h0, c0):
    """Single fused dispatch: row packing + pallas_call + output slice.

    seqs: (B, EMBED_LEN) f32; h0/c0: (B, HIDDEN_LEN) f32. Returns (B,) outputs.
    """
    E, H = EMBED_LEN, HIDDEN_LEN
    B = seqs.shape[0]
    pad_b = -(-B // ROW_TILE) * ROW_TILE          # static (shapes are static)

    # Lane-dense row tiles: xh row b = [x_b | h0_b | 0...], c0 row b = [c0_b | 0...]
    xh = jnp.zeros((pad_b, LANES), jnp.float32)
    xh = xh.at[:B, :E].set(seqs)
    xh = xh.at[:B, E:E + H].set(h0)
    c0t = jnp.zeros((pad_b, LANES), jnp.float32)
    c0t = c0t.at[:B, :H].set(c0)

    out_tile = pl.pallas_call(
        _lstm_head_kernel,
        out_shape=jax.ShapeDtypeStruct((pad_b, LANES), jnp.float32),
        grid=(pad_b // ROW_TILE,),
        in_specs=[
            pl.BlockSpec((ROW_TILE, LANES), lambda b: (b, 0)),     # xh rows
            pl.BlockSpec((ROW_TILE, LANES), lambda b: (b, 0)),     # c0 rows
            pl.BlockSpec((SLAB_ROWS, LANES), lambda b: (0, 0)),    # params, resident
        ],
        out_specs=pl.BlockSpec((ROW_TILE, LANES), lambda b: (b, 0)),
        compiler_params=pltpu.CompilerParams(
            dimension_semantics=("parallel",)),                    # 2 TCs on v7x
    )(xh, c0t, slab)

    return out_tile[:B, 0]                                          # (B,)


def _prep_sequence(input_sequence):
    # Static-shape pad/truncate (Python branch on the static length; retraces
    # under jit only once per distinct input length).
    E = EMBED_LEN
    seq = jnp.asarray(input_sequence, jnp.float32)
    L = seq.shape[0]
    if L < E:
        seq = jnp.concatenate([seq, jnp.zeros((E - L,), jnp.float32)])
    elif L > E:
        seq = seq[:E]
    return seq


def simple_lstm_forward(slab, input_sequence, h0=None, c0=None):
    """Mirrors SimpleLSTM.forward for a single 1-D sequence."""
    H = HIDDEN_LEN
    seq = _prep_sequence(input_sequence)
    if h0 is None:
        h0 = jnp.zeros((1, H), jnp.float32)
    if c0 is None:
        c0 = jnp.zeros((1, H), jnp.float32)
    out = _lstm_forward_jit(slab, seq[None, :], h0, c0)             # (1,)
    # Module returns the ORIGINAL h0/c0 (detach().clone()), not the post-step
    # states, so returning the inputs unchanged is the correct semantics.
    return out, h0, c0


def simple_lstm_forward_batched(slab, seqs, h0=None, c0=None):
    """Throughput path: B sequences at once (each padded/truncated to E)."""
    E, H = EMBED_LEN, HIDDEN_LEN
    seqs = jnp.asarray(seqs, jnp.float32)
    B, L = seqs.shape
    if L < E:
        seqs = jnp.pad(seqs, ((0, 0), (0, E - L)))
    elif L > E:
        seqs = seqs[:, :E]
    if h0 is None:
        h0 = jnp.zeros((B, H), jnp.float32)
    if c0 is None:
        c0 = jnp.zeros((B, H), jnp.float32)
    return _lstm_forward_jit(slab, seqs, h0, c0), h0, c0


def simple_lstm_reference(raw, input_sequence, h0=None, c0=None):
    """Pure-JAX reference using the unfused per-layer parameters."""
    E, H = EMBED_LEN, HIDDEN_LEN
    x = _prep_sequence(input_sequence).reshape(1, E)
    if h0 is None:
        h0 = jnp.zeros((1, H), jnp.float32)
    if c0 is None:
        c0 = jnp.zeros((1, H), jnp.float32)

    gates = x @ raw["wih_t"] + raw["b_ih"] + h0 @ raw["whh_t"] + raw["b_hh"]
    i_g = jax.nn.sigmoid(gates[:, 0 * H:1 * H])
    f_g = jax.nn.sigmoid(gates[:, 1 * H:2 * H])
    g_g = jnp.tanh(gates[:, 2 * H:3 * H])
    o_g = jax.nn.sigmoid(gates[:, 3 * H:4 * H])
    c1 = f_g * c0 + i_g * g_g
    h1 = o_g * jnp.tanh(c1)

    y = h1 @ raw["w1_t"] + raw["b1"]
    y = y @ raw["w2_t"] + raw["b2"]
    y = y @ raw["w3_t"] + raw["b3"]
    y = y @ raw["w4_t"] + raw["b4"]
    return y.reshape(1,), h0, c0


if __name__ == "__main__":
    key = jax.random.PRNGKey(0)
    k_param, k_in, k_batch = jax.random.split(key, 3)

    raw_params = init_params(k_param)
    slab = pack_params(raw_params)

    # --- single-sequence path (module semantics); len 8 < 16 exercises padding
    input_sequence = jax.random.normal(k_in, (8,), jnp.float32)
    output, h0, c0 = simple_lstm_forward(slab, input_sequence)
    jax.block_until_ready(output)
    jax.block_until_ready(h0)
    jax.block_until_ready(c0)

    ref_out, _, _ = simple_lstm_reference(raw_params, input_sequence)
    assert output.shape == (1,)
    assert h0.shape == (1, HIDDEN_LEN) and c0.shape == (1, HIDDEN_LEN)
    assert jnp.allclose(output, ref_out, rtol=1e-4, atol=1e-4), (output, ref_out)

    # --- batched throughput path: 16 sequences of length EMBED_LEN
    batch = 16
    seqs = jax.random.normal(k_batch, (batch, EMBED_LEN), jnp.float32)
    outs, _, _ = simple_lstm_forward_batched(slab, seqs)
    jax.block_until_ready(outs)

    refs = jnp.stack([simple_lstm_reference(raw_params, seqs[b])[0][0]
                      for b in range(batch)])
    assert outs.shape == (batch,)
    assert jnp.allclose(outs, refs, rtol=1e-4, atol=1e-4), (outs, refs)

    print("KERNEL_OK")
</pallas_src>

<mosaic_0001>
module attributes {stable_mosaic.version = 11 : i64} {
  func.func @_lstm_head_kernel(%arg0: i32, %arg1: memref<8x128xf32, #tpu.memory_space<vmem>>, %arg2: memref<8x128xf32, #tpu.memory_space<vmem>>, %arg3: memref<72x128xf32, #tpu.memory_space<vmem>>, %arg4: memref<8x128xf32, #tpu.memory_space<vmem>>) attributes {dimension_semantics = [#tpu.dimension_semantics<parallel>], iteration_bounds = array<i64: 1>, scalar_prefetch = 0 : i64, scratch_operands = 0 : i64, tpu.core_type = #tpu.core_type<tc>, window_params = [{transform_indices = @transform_0, window_bounds = array<i64: 8, 128>}, {transform_indices = @transform_1, window_bounds = array<i64: 8, 128>}, {pipeline_mode = #tpu.pipeline_mode<synchronous>, transform_indices = @transform_2, window_bounds = array<i64: 72, 128>}, {transform_indices = @transform_3, window_bounds = array<i64: 8, 128>}]} {
    %c0 = arith.constant 0 : index
    %c0_0 = arith.constant 0 : index
    %0 = vector.load %arg1[%c0, %c0_0] : memref<8x128xf32, #tpu.memory_space<vmem>>, vector<8x48xf32>
    %c0_1 = arith.constant 0 : index
    %c0_2 = arith.constant 0 : index
    %1 = vector.load %arg3[%c0_1, %c0_2] : memref<72x128xf32, #tpu.memory_space<vmem>>, vector<48x128xf32>
    %cst = arith.constant dense<0.000000e+00> : vector<8x128xf32>
    %2 = tpu.matmul %0, %1, %cst {dimension_numbers = #tpu.dot_dimension_numbers<[1], [0], [0], [1], [0, 0, 1, 1], [], []>} : vector<8x48xf32>, vector<48x128xf32>, vector<8x128xf32> -> vector<8x128xf32>
    %c48 = arith.constant 48 : index
    %c0_3 = arith.constant 0 : index
    %3 = vector.load %arg3[%c48, %c0_3] : memref<72x128xf32, #tpu.memory_space<vmem>>, vector<1x128xf32>
    %4 = vector.broadcast %3 : vector<1x128xf32> to vector<8x128xf32>
    %5 = arith.addf %2, %4 : vector<8x128xf32>
    %6 = math.tanh %5 : vector<8x128xf32>
    %cst_4 = arith.constant 5.000000e-01 : f32
    %7 = vector.broadcast %cst_4 : f32 to vector<8x128xf32>
    %8 = arith.mulf %7, %6 : vector<8x128xf32>
    %cst_5 = arith.constant 5.000000e-01 : f32
    %9 = vector.broadcast %cst_5 : f32 to vector<8x128xf32>
    %10 = arith.addf %8, %9 : vector<8x128xf32>
    %11 = vector.extract_strided_slice %10 {offsets = [0, 0], sizes = [8, 32], strides = [1, 1]} : vector<8x128xf32> to vector<8x32xf32>
    %12 = vector.extract_strided_slice %10 {offsets = [0, 32], sizes = [8, 32], strides = [1, 1]} : vector<8x128xf32> to vector<8x32xf32>
    %13 = vector.extract_strided_slice %6 {offsets = [0, 64], sizes = [8, 32], strides = [1, 1]} : vector<8x128xf32> to vector<8x32xf32>
    %14 = vector.extract_strided_slice %10 {offsets = [0, 96], sizes = [8, 32], strides = [1, 1]} : vector<8x128xf32> to vector<8x32xf32>
    %c0_6 = arith.constant 0 : index
    %c0_7 = arith.constant 0 : index
    %15 = vector.load %arg2[%c0_6, %c0_7] : memref<8x128xf32, #tpu.memory_space<vmem>>, vector<8x32xf32>
    %16 = arith.mulf %12, %15 : vector<8x32xf32>
    %17 = arith.mulf %11, %13 : vector<8x32xf32>
    %18 = arith.addf %16, %17 : vector<8x32xf32>
    %19 = math.tanh %18 : vector<8x32xf32>
    %20 = arith.mulf %14, %19 : vector<8x32xf32>
    %c56 = arith.constant 56 : index
    %c0_8 = arith.constant 0 : index
    %21 = vector.load %arg3[%c56, %c0_8] : memref<72x128xf32, #tpu.memory_space<vmem>>, vector<1x32xf32>
    %22 = vector.broadcast %21 : vector<1x32xf32> to vector<8x32xf32>
    %23 = arith.mulf %20, %22 : vector<8x32xf32>
    %cst_9 = arith.constant dense<0.000000e+00> : vector<8xf32>
    %24 = vector.multi_reduction <add>, %23, %cst_9 [1] : vector<8x32xf32> to vector<8xf32>
    %25 = vector.shape_cast %24 : vector<8xf32> to vector<8x1xf32>
    %c64 = arith.constant 64 : index
    %c0_10 = arith.constant 0 : index
    %26 = vector.load %arg3[%c64, %c0_10] : memref<72x128xf32, #tpu.memory_space<vmem>>, vector<1x128xf32>
    %27 = vector.broadcast %25 : vector<8x1xf32> to vector<8x128xf32>
    %28 = vector.broadcast %26 : vector<1x128xf32> to vector<8x128xf32>
    %29 = arith.addf %27, %28 : vector<8x128xf32>
    %c0_11 = arith.constant 0 : index
    %c0_12 = arith.constant 0 : index
    %30 = vector.load %arg4[%c0_11, %c0_12] : memref<8x128xf32, #tpu.memory_space<vmem>>, vector<8x128xf32>
    tpu.vector_store %arg4[%c0_11, %c0_12], %29 {strides = array<i32>} : memref<8x128xf32, #tpu.memory_space<vmem>>, vector<8x128xf32>,
    return
  }
  func.func @transform_0(%arg0: i32) -> (i32, i32) {
    %c0_i32 = arith.constant 0 : i32
    %c0_i32_0 = arith.constant 0 : i32
    return %arg0, %c0_i32 : i32, i32
  }
  func.func @transform_1(%arg0: i32) -> (i32, i32) {
    %c0_i32 = arith.constant 0 : i32
    %c0_i32_0 = arith.constant 0 : i32
    return %arg0, %c0_i32 : i32, i32
  }
  func.func @transform_2(%arg0: i32) -> (i32, i32) {
    %c0_i32 = arith.constant 0 : i32
    %c0_i32_0 = arith.constant 0 : i32
    %c0_i32_1 = arith.constant 0 : i32
    return %c0_i32, %c0_i32_0 : i32, i32
  }
  func.func @transform_3(%arg0: i32) -> (i32, i32) {
    %c0_i32 = arith.constant 0 : i32
    %c0_i32_0 = arith.constant 0 : i32
    return %arg0, %c0_i32 : i32, i32
  }
}

</mosaic_0001>

<bundles_post_ra>
// kernel: _lstm_forward_jit.1
= control target key start
LH: loop header
LB: loop body
LE: loop exit
PB: predicated region body
PF: predicated region fallthrough
CT: control target
= control target key end

     0   :  { %8 = vsyncpa [#allocation3], 0  ;;  %s152_s15 = smov [#allocation2]   ;;  %s153_s17 = smov 128   ;;  %s190_s0 = inlined_call_operand.vmem [shape: f32[8,128], index: 0, kind: input, shape index: {}]   ;;  %s191_s1 = inlined_call_operand.vmem [shape: f32[8,128], index: 1, kind: input, shape index: {}]   ;;  %s192_s2 = inlined_call_operand.hbm [shape: f32[72,128], index: 2, kind: input, shape index: {}]   ;;  %s193_s3 = inlined_call_operand.vmem [shape: f32[8,128], index: 3, kind: output, shape index: {}]  }
   0x1   :  { %s17_s14 = sshll.u32 %s192_s2, 4  ;;  %s19_s16 = sshll.u32 %s152_s15, 4  ;;  %s18_s14 = int_to_ptr.hbm [resolvable:$true] %s17_s14  ;;  %s20_s16 = int_to_ptr.vmem [resolvable:$true] %s19_s16 }
   0x2   :  { %s154_s18 = smov 8  }
   0x3   :  { %25 = dma.hbm_to_vmem [thread:$0]  %s18_s14, 1152, %s20_s16, [#allocation3], %s153_s17, %s153_s17, %s154_s18  }
   0x4   :  { %150 = dma.done.wait [#allocation3], 1152  }
   0x5   :  { %151 = vsyncadd [#allocation3], 4294966144  ;;  %v36_v0 = vld [vmem:[#allocation2 + $0x28] sm:$0xff]  ;;  %v35_v1 = vld [vmem:[#allocation2 + $0x20] sm:$0xff]  ;;  %vm39_vm0 = vcmask 392192   ;;  %s155_s20 = smov 64  }
   0x6   :  { %53 = vmatpush.msra.mxu0 %v36_v0  ;;  %v34_v2 = vld [vmem:[#allocation2 + $0x18] sm:$0xff]  ;;  %v33_v3 = vld [vmem:[#allocation2 + $0x10] sm:$0xff]  ;;  %v32_v4 = vld [vmem:[#allocation2 + $0x8] sm:$0xff]  ;;  %s156_s23 = smov 32   ;;  %vm99_vm1 = vcmask 261120  }
   0x7   :  { %v31_v5 = vld [vmem:[#allocation2] sm:$0xff]  ;;  %v119_v7 = vld [vmem:[#allocation2 + $0x30] ss:$0 sm:$0xff]  ;;  %v120_v16 = vld [vmem:[#allocation2 + $0x38] ss:$0 sm:$0xff] }
   0x8   :  { %54 = vmatpush.msra.mxu0 %v35_v1  ;;  %v30_v6 = vld [vmem:[%s190_s0] sm:$0xff]  ;;  %s157_s0 = smov 96  }
   0x9   :  { %v66_v11 = vld [vmem:[%s191_s1] sm:$0xff]  ;;  %91 = vrot.lane.b32.xlu2 %v120_v16, %s157_s0 }
   0xa   :  { %55 = vmatpush.msra.mxu0 %v34_v2  ;;  %v121_v28 = vld [vmem:[#allocation2 + $0x40] ss:$0 sm:$0xff] }
   0xc   :  { %56 = vmatpush.msra.mxu0 %v33_v3 }
   0xe   :  { %57 = vmatpush.msra.mxu0 %v32_v4 }
  0x10   :  { %58 = vmatpush.msra.mxu0 %v31_v5 }
  0x11   :  { %112 = vmatmul.msk.f32.vlgmr.msra.gmra.mxu0 %vm39_vm0, %v30_v6 }
  0x63   :  { %v92_v23 = vpop.permute.xlu2 %91 }
  0x8e   :  { %v60_v8 = vpop.f32.mrf.mxu0 }
  0x8f   :  { %v61_v9 = vadd.f32 %v119_v7, %v60_v8 }
  0x91   :  { %122 = vtanh.f32 %v61_v9 }
  0x97   :  { %v123_v10 = vpop.eup %122 }
  0x98   :  { %73 = vrot.lane.b32.xlu0 %v123_v10, %s155_s20  ;;  %v64_v12 = vmul.f32 0.5, %v123_v10 }
  0x9a   :  { %v65_v13 = vadd.f32 0.5, %v64_v12 }
  0xa0   :  { %68 = vrot.lane.b32.xlu0 %v66_v11, %s156_s23 }
 0x10a   :  { %v74_v14 = vpop.permute.xlu0 %73 }
 0x10b   :  { %v76_v15 = vmul.f32 %v74_v14, %v65_v13 }
 0x10d   :  { %78 = vrot.lane.b32.xlu1 %v76_v15, %s156_s23 }
 0x112   :  { %v69_v17 = vpop.permute.xlu0 %68 }
 0x113   :  { %v71_v18 = vmul.f32 %v69_v17, %v65_v13 }
 0x17f   :  { %v79_v19 = vpop.permute.xlu1 %78 }
 0x180   :  { %v81_v20 = vadd.f32 %v79_v19, %v71_v18 }
 0x182   :  { %124 = vtanh.f32 %v81_v20 }
 0x188   :  { %v125_v21 = vpop.eup %124 }
 0x189   :  { %84 = vrot.lane.b32.xlu1 %v125_v21, %s155_s20 }
 0x1fb   :  { %v85_v22 = vpop.permute.xlu1 %84 }
 0x1fc   :  { %v87_v24 = vmul.f32 %v85_v22, %v65_v13 }
 0x1fe   :  { %v94_v25 = vmul.f32 %v92_v23, %v87_v24 }
 0x200   :  { %96 = vrot.lane.b32.xlu2 %v94_v25, %s156_s23 }
 0x25a   :  { %v97_v26 = vpop.permute.xlu2 %96 }
 0x25b   :  { %v100_v27 = vsel %vm99_vm1, %v97_v26, 0.0 }
 0x25c   :  { %101 = vadd.xlane.f32.xlu0 %v100_v27 }
 0x2cf   :  { %v102_v29 = vpop.xlane.xlu0 %101 }
 0x2d0   :  { %v105_v30 = vadd.f32 %v121_v28, %v102_v29 }
 0x2d2   :  { %106 = vst [vmem:[%s193_s3] sm:$0xff] %v105_v30 }
 0x2d3   :  { %111 = vsyncpa [#allocation3], 1 }

</bundles_post_ra>
